<compile_context>
chip_gen: v7x
topology: tpu7x:2x2x1
jax: 0.10.0
libtpu: 0.0.40
codegen_flags: <defaults>
</compile_context>

<pallas_src>
import functools

import jax
import jax.numpy as jnp
from jax.experimental import pallas as pl
from jax.experimental.pallas import tpu as pltpu


def _round_up(x, m):
    return ((x + m - 1) // m) * m


def _sublane(dtype):
    # minimum batch-tile alignment by element width (f32: 8, bf16: 16, int8/fp8: 32)
    return {4: 8, 2: 16, 1: 32}.get(jnp.dtype(dtype).itemsize, 8)


# ---------------------------------------------------------------------------
# Single-step kernel (the module's forward): two MXU matmuls, fused 3H gates.
# ---------------------------------------------------------------------------

def gru_cell_kernel(x_ref, h_ref, wih_ref, whh_ref, bg_ref, bhn_ref, o_ref):
    """Fused-gate GRUCell block.

    x_ref:   (tm, I)      input tile
    h_ref:   (tm, H)      previous hidden tile
    wih_ref: (I, 3H)      input->hidden weights, columns in (r, z, n) order
    whh_ref: (H, 3H)      hidden->hidden weights, columns in (r, z, n) order
    bg_ref:  (1, 3H)      [b_ih_r + b_hh_r, b_ih_z + b_hh_z, b_ih_n]
    bhn_ref: (1, H)       b_hh_n (must stay inside r * (.))
    o_ref:   (tm, H)      new hidden tile
    """
    x = x_ref[...]
    h = h_ref[...]
    h_f32 = h.astype(jnp.float32)

    # Two MXU matmuls with N = 3H (lane-dense), f32 accumulation.
    gi = jnp.dot(x.astype(wih_ref.dtype), wih_ref[...],
                 preferred_element_type=jnp.float32) + bg_ref[...]
    gh = jnp.dot(h.astype(whh_ref.dtype), whh_ref[...],
                 preferred_element_type=jnp.float32)

    H = o_ref.shape[1]
    gi_r, gi_z, gi_n = gi[:, :H], gi[:, H:2 * H], gi[:, 2 * H:]
    gh_r, gh_z = gh[:, :H], gh[:, H:2 * H]
    gh_n = gh[:, 2 * H:] + bhn_ref[...]

    r = jax.nn.sigmoid(gi_r + gh_r)
    z = jax.nn.sigmoid(gi_z + gh_z)
    n = jnp.tanh(gi_n + r * gh_n)

    # h' = (1 - z) * n + z * h  ==  n + z * (h - n)
    o_ref[...] = (n + z * (h_f32 - n)).astype(o_ref.dtype)


def init_gru_params(key, input_size, hidden_size, dtype=jnp.float32):
    """PyTorch GRUCell parameter shapes:
       weight_ih (3H, I), weight_hh (3H, H), bias_ih (3H,), bias_hh (3H,),
       uniform(-1/sqrt(H), 1/sqrt(H))."""
    k = 1.0 / jnp.sqrt(jnp.asarray(hidden_size, dtype))
    k1, k2, k3, k4 = jax.random.split(key, 4)
    w_ih = jax.random.uniform(k1, (3 * hidden_size, input_size), dtype, -k, k)
    w_hh = jax.random.uniform(k2, (3 * hidden_size, hidden_size), dtype, -k, k)
    b_ih = jax.random.uniform(k3, (3 * hidden_size,), dtype, -k, k)
    b_hh = jax.random.uniform(k4, (3 * hidden_size,), dtype, -k, k)
    return w_ih, w_hh, b_ih, b_hh


def prepare_gru_params(w_ih, w_hh, b_ih, b_hh, mxu_dtype=None):
    """One-time parameter prep for the single-step kernel (off the hot path).

    Returns:
      wih: (I, 3H)   = w_ih.T        (gate columns stay in (r, z, n) order)
      whh: (H, 3H)   = w_hh.T
      bg:  (1, 3H)   = [b_ih_r + b_hh_r, b_ih_z + b_hh_z, b_ih_n]
      bhn: (1, H)    = b_hh_n
    """
    H3 = w_ih.shape[0]
    H = H3 // 3
    wih = w_ih.T
    whh = w_hh.T
    if mxu_dtype is not None:
        wih = wih.astype(mxu_dtype)
        whh = whh.astype(mxu_dtype)
    bg = jnp.concatenate(
        [b_ih[:2 * H] + b_hh[:2 * H], b_ih[2 * H:]]
    ).astype(jnp.float32).reshape(1, 3 * H)
    bhn = b_hh[2 * H:].astype(jnp.float32).reshape(1, H)
    return wih, whh, bg, bhn


@functools.partial(jax.jit, static_argnames=("block_b",))
def attention_rnn_forward(x, hidden, wih, whh, bg, bhn, *, block_b=512):
    """Single GRUCell step (== AttentionRNN.forward).

    The batch tile covers the whole (alignment-rounded) batch when it fits
    `block_b`, so small batches run as grid=(1,) with no MXU starvation and no
    per-call padding of x/hidden.
    For bf16 activation-DMA, pass x/hidden already cast to bf16; gate/combine
    math stays in f32 inside the kernel.
    """
    B, I = x.shape
    H = hidden.shape[1]

    sub = max(_sublane(x.dtype), _sublane(hidden.dtype))
    tm = min(_round_up(B, sub), _round_up(block_b, sub))
    Bp = _round_up(B, tm)
    if Bp != B:  # only hit when B is not alignment-divisible; otherwise no pad.
        x = jnp.pad(x, ((0, Bp - B), (0, 0)))
        hidden = jnp.pad(hidden, ((0, Bp - B), (0, 0)))
    grid = (Bp // tm,)

    # VMEM budget: resident weights + double-buffered activation tiles + temps.
    w_bytes = (wih.size * jnp.dtype(wih.dtype).itemsize
               + whh.size * jnp.dtype(whh.dtype).itemsize
               + (bg.size + bhn.size) * 4)
    act_bytes = 2 * (tm * I + 2 * tm * H) * jnp.dtype(x.dtype).itemsize
    tmp_bytes = 2 * tm * 3 * H * 4
    vmem_limit = int(min(56 * 2**20,
                         max(4 * 2**20, 2 * (w_bytes + act_bytes + tmp_bytes))))

    out = pl.pallas_call(
        gru_cell_kernel,
        out_shape=jax.ShapeDtypeStruct((Bp, H), x.dtype),
        grid_spec=pltpu.PrefetchScalarGridSpec(
            num_scalar_prefetch=0,
            grid=grid,
            in_specs=[
                pl.BlockSpec((tm, I), lambda i: (i, 0)),        # x: tiled over batch
                pl.BlockSpec((tm, H), lambda i: (i, 0)),        # h: tiled over batch
                pl.BlockSpec((I, 3 * H), lambda i: (0, 0)),     # W_ih: resident
                pl.BlockSpec((H, 3 * H), lambda i: (0, 0)),     # W_hh: resident
                pl.BlockSpec((1, 3 * H), lambda i: (0, 0)),     # fused bias: resident
                pl.BlockSpec((1, H), lambda i: (0, 0)),         # b_hh_n: resident
            ],
            out_specs=pl.BlockSpec((tm, H), lambda i: (i, 0)),
        ),
        compiler_params=pltpu.CompilerParams(
            dimension_semantics=("parallel",),
            vmem_limit_bytes=vmem_limit,
        ),
    )(x, hidden, wih, whh, bg, bhn)

    return out[:B]


# ---------------------------------------------------------------------------
# Sequence kernel: one pallas_call, grid over (batch_tiles, T), weights
# resident in VMEM, hidden carried in an f32 VMEM scratch, single fused
# [x|h] K=(I+H) matmul per step (fills the 256-deep MXU on v6e/v7x).
# ---------------------------------------------------------------------------

def prepare_gru_params_fused(w_ih, w_hh, b_ih, b_hh, mxu_dtype=None):
    """One-time prep for the fused [x|h] sequence kernel.

    Returns:
      wblk: (I+H, 4H) = [[W_ih_r, W_ih_z, W_ih_n, 0   ],
                         [W_hh_r, W_hh_z, 0,      W_hh_n]]   (transposed blocks)
      bblk: (1, 4H)   = [b_ih_r + b_hh_r, b_ih_z + b_hh_z, b_ih_n, b_hh_n]
    gi_n and gh_n stay in separate columns so n = tanh(gi_n + r*(gh_n+b_hh_n)).
    """
    H3, I = w_ih.shape
    H = H3 // 3
    wih_t = w_ih.T  # (I, 3H) columns (r, z, n)
    whh_t = w_hh.T  # (H, 3H) columns (r, z, n)
    top = jnp.concatenate(
        [wih_t[:, :2 * H], wih_t[:, 2 * H:], jnp.zeros((I, H), wih_t.dtype)], axis=1)
    bot = jnp.concatenate(
        [whh_t[:, :2 * H], jnp.zeros((H, H), whh_t.dtype), whh_t[:, 2 * H:]], axis=1)
    wblk = jnp.concatenate([top, bot], axis=0)  # (I+H, 4H)
    if mxu_dtype is not None:
        wblk = wblk.astype(mxu_dtype)
    bblk = jnp.concatenate(
        [b_ih[:2 * H] + b_hh[:2 * H], b_ih[2 * H:], b_hh[2 * H:]]
    ).astype(jnp.float32).reshape(1, 4 * H)
    return wblk, bblk


def gru_seq_kernel(x_ref, h0_ref, wblk_ref, bblk_ref, o_ref, xh_ref):
    """One GRU step at grid point (batch tile b, timestep t).

    x_ref:    (1, tm, I)     input tile for timestep t
    h0_ref:   (tm, H)        initial hidden tile (consumed only at t == 0)
    wblk_ref: (I+H, 4H)      fused weight block, columns (r_sum, z_sum, gi_n, gh_n)
    bblk_ref: (1, 4H)        fused bias row
    o_ref:    (1, tm, H)     hidden output for timestep t
    xh_ref:   (tm, I+H) f32  scratch; columns [I:] carry the hidden state over t
    """
    t = pl.program_id(1)
    H = o_ref.shape[-1]
    I = x_ref.shape[-1]

    @pl.when(t == 0)
    def _():
        xh_ref[:, I:] = h0_ref[...].astype(jnp.float32)

    xh_ref[:, :I] = x_ref[0].astype(jnp.float32)
    xh = xh_ref[...]

    # Single MXU matmul with contraction depth K = I + H.
    g = jnp.dot(xh.astype(wblk_ref.dtype), wblk_ref[...],
                preferred_element_type=jnp.float32) + bblk_ref[...]

    r = jax.nn.sigmoid(g[:, :H])
    z = jax.nn.sigmoid(g[:, H:2 * H])
    n = jnp.tanh(g[:, 2 * H:3 * H] + r * g[:, 3 * H:4 * H])

    h_prev = xh[:, I:]
    h_new = n + z * (h_prev - n)

    xh_ref[:, I:] = h_new                      # carry hidden in VMEM (f32)
    o_ref[...] = h_new[None].astype(o_ref.dtype)


@functools.partial(jax.jit, static_argnames=("block_b",))
def attention_rnn_sequence(xs, hidden, wblk, bblk, *, block_b=512):
    """Run the GRU cell over a whole sequence xs: (T, B, I) -> (T, B, H)."""
    T, B, I = xs.shape
    H = hidden.shape[1]
    K = I + H

    sub = max(_sublane(xs.dtype), _sublane(hidden.dtype))
    tm = min(_round_up(B, sub), _round_up(block_b, sub))
    Bp = _round_up(B, tm)
    if Bp != B:  # one-time pad for the whole sequence, not per step.
        xs = jnp.pad(xs, ((0, 0), (0, Bp - B), (0, 0)))
        hidden = jnp.pad(hidden, ((0, Bp - B), (0, 0)))
    grid = (Bp // tm, T)   # T last: hidden carry / resident weights across T

    w_bytes = wblk.size * jnp.dtype(wblk.dtype).itemsize + bblk.size * 4
    act_bytes = 2 * (tm * I + tm * H) * jnp.dtype(xs.dtype).itemsize
    scratch_bytes = tm * K * 4 + 2 * tm * 4 * H * 4
    vmem_limit = int(min(56 * 2**20,
                         max(4 * 2**20, 2 * (w_bytes + act_bytes + scratch_bytes))))

    out = pl.pallas_call(
        gru_seq_kernel,
        out_shape=jax.ShapeDtypeStruct((T, Bp, H), xs.dtype),
        grid_spec=pltpu.PrefetchScalarGridSpec(
            num_scalar_prefetch=0,
            grid=grid,
            in_specs=[
                pl.BlockSpec((1, tm, I), lambda b, t: (t, b, 0)),   # x_t tile
                pl.BlockSpec((tm, H), lambda b, t: (b, 0)),         # h0 tile
                pl.BlockSpec((K, 4 * H), lambda b, t: (0, 0)),      # weights: resident
                pl.BlockSpec((1, 4 * H), lambda b, t: (0, 0)),      # bias: resident
            ],
            out_specs=pl.BlockSpec((1, tm, H), lambda b, t: (t, b, 0)),
            scratch_shapes=[pltpu.VMEM((tm, K), jnp.float32)],
        ),
        compiler_params=pltpu.CompilerParams(
            dimension_semantics=("parallel", "arbitrary"),
            vmem_limit_bytes=vmem_limit,
        ),
    )(xs, hidden, wblk, bblk)

    return out[:, :B]


# ---------------------------------------------------------------------------
# Plain-JAX references
# ---------------------------------------------------------------------------

def gru_cell_reference(x, hidden, w_ih, w_hh, b_ih, b_hh):
    """Plain-JAX reference matching torch.nn.GRUCell exactly."""
    H = hidden.shape[1]
    gi = x @ w_ih.T + b_ih
    gh = hidden @ w_hh.T + b_hh
    i_r, i_z, i_n = gi[:, :H], gi[:, H:2 * H], gi[:, 2 * H:]
    h_r, h_z, h_n = gh[:, :H], gh[:, H:2 * H], gh[:, 2 * H:]
    r = jax.nn.sigmoid(i_r + h_r)
    z = jax.nn.sigmoid(i_z + h_z)
    n = jnp.tanh(i_n + r * h_n)
    return (1.0 - z) * n + z * hidden


if __name__ == "__main__":
    batch = 16
    input_size = 128   # lane-dense (multiple of 128)
    hidden_size = 128  # lane-dense gate columns
    seq_len = 8

    key = jax.random.PRNGKey(0)
    kp, kx, kh, ks = jax.random.split(key, 4)

    w_ih, w_hh, b_ih, b_hh = init_gru_params(kp, input_size, hidden_size)
    x = jax.random.normal(kx, (batch, input_size), jnp.float32)
    hidden = jax.random.normal(kh, (batch, hidden_size), jnp.float32)

    ref = gru_cell_reference(x, hidden, w_ih, w_hh, b_ih, b_hh)

    # --- single step, f32 MXU operands (module forward; tight tolerance) ---
    params_f32 = prepare_gru_params(w_ih, w_hh, b_ih, b_hh)
    out_f32 = jax.block_until_ready(attention_rnn_forward(x, hidden, *params_f32))
    assert out_f32.shape == (batch, hidden_size)
    assert jnp.allclose(out_f32, ref, atol=5e-5, rtol=5e-5), "f32 mismatch vs reference"

    # --- single step, bf16 weights + bf16 activation DMA (relaxed tolerance) ---
    params_bf16 = prepare_gru_params(w_ih, w_hh, b_ih, b_hh, mxu_dtype=jnp.bfloat16)
    out_bf16 = jax.block_until_ready(
        attention_rnn_forward(x.astype(jnp.bfloat16), hidden.astype(jnp.bfloat16),
                              *params_bf16))
    assert jnp.allclose(out_bf16.astype(jnp.float32), ref, atol=5e-2, rtol=5e-2), \
        "bf16 mismatch vs reference"

    # --- full sequence: one pallas_call, grid over T, hidden carried in VMEM ---
    xs = jax.random.normal(ks, (seq_len, batch, input_size), jnp.float32)
    wblk, bblk = prepare_gru_params_fused(w_ih, w_hh, b_ih, b_hh)
    out_seq = jax.block_until_ready(attention_rnn_sequence(xs, hidden, wblk, bblk))

    def scan_step(h, xt):
        h_new = gru_cell_reference(xt, h, w_ih, w_hh, b_ih, b_hh)
        return h_new, h_new

    _, ref_seq = jax.lax.scan(scan_step, hidden, xs)
    assert out_seq.shape == (seq_len, batch, hidden_size)
    assert jnp.allclose(out_seq, ref_seq, atol=5e-4, rtol=5e-4), "sequence mismatch"

    print("KERNEL_OK")
</pallas_src>

<mosaic_0001>
module attributes {stable_mosaic.version = 11 : i64} {
  func.func @gru_cell_kernel(%arg0: i32, %arg1: memref<16x128xf32, #tpu.memory_space<vmem>>, %arg2: memref<16x128xf32, #tpu.memory_space<vmem>>, %arg3: memref<128x384xf32, #tpu.memory_space<vmem>>, %arg4: memref<128x384xf32, #tpu.memory_space<vmem>>, %arg5: memref<1x384xf32, #tpu.memory_space<vmem>>, %arg6: memref<1x128xf32, #tpu.memory_space<vmem>>, %arg7: memref<16x128xf32, #tpu.memory_space<vmem>>) attributes {dimension_semantics = [#tpu.dimension_semantics<parallel>], iteration_bounds = array<i64: 1>, scalar_prefetch = 0 : i64, scratch_operands = 0 : i64, tpu.core_type = #tpu.core_type<tc>, window_params = [{transform_indices = @transform_0, window_bounds = array<i64: 16, 128>}, {transform_indices = @transform_1, window_bounds = array<i64: 16, 128>}, {pipeline_mode = #tpu.pipeline_mode<synchronous>, transform_indices = @transform_2, window_bounds = array<i64: 128, 384>}, {pipeline_mode = #tpu.pipeline_mode<synchronous>, transform_indices = @transform_3, window_bounds = array<i64: 128, 384>}, {pipeline_mode = #tpu.pipeline_mode<synchronous>, transform_indices = @transform_4, window_bounds = array<i64: 1, 384>}, {pipeline_mode = #tpu.pipeline_mode<synchronous>, transform_indices = @transform_5, window_bounds = array<i64: 1, 128>}, {transform_indices = @transform_6, window_bounds = array<i64: 16, 128>}]} {
    %c0 = arith.constant 0 : index
    %c0_0 = arith.constant 0 : index
    %0 = vector.load %arg1[%c0, %c0_0] : memref<16x128xf32, #tpu.memory_space<vmem>>, vector<16x128xf32>
    %c0_1 = arith.constant 0 : index
    %c0_2 = arith.constant 0 : index
    %1 = vector.load %arg2[%c0_1, %c0_2] : memref<16x128xf32, #tpu.memory_space<vmem>>, vector<16x128xf32>
    %c0_3 = arith.constant 0 : index
    %c0_4 = arith.constant 0 : index
    %2 = vector.load %arg3[%c0_3, %c0_4] : memref<128x384xf32, #tpu.memory_space<vmem>>, vector<128x384xf32>
    %cst = arith.constant dense<0.000000e+00> : vector<16x384xf32>
    %3 = tpu.matmul %0, %2, %cst {dimension_numbers = #tpu.dot_dimension_numbers<[1], [0], [0], [1], [0, 0, 1, 1], [], []>} : vector<16x128xf32>, vector<128x384xf32>, vector<16x384xf32> -> vector<16x384xf32>
    %c0_5 = arith.constant 0 : index
    %c0_6 = arith.constant 0 : index
    %4 = vector.load %arg5[%c0_5, %c0_6] : memref<1x384xf32, #tpu.memory_space<vmem>>, vector<1x384xf32>
    %5 = vector.broadcast %4 : vector<1x384xf32> to vector<16x384xf32>
    %6 = arith.addf %3, %5 : vector<16x384xf32>
    %c0_7 = arith.constant 0 : index
    %c0_8 = arith.constant 0 : index
    %7 = vector.load %arg4[%c0_7, %c0_8] : memref<128x384xf32, #tpu.memory_space<vmem>>, vector<128x384xf32>
    %cst_9 = arith.constant dense<0.000000e+00> : vector<16x384xf32>
    %8 = tpu.matmul %1, %7, %cst_9 {dimension_numbers = #tpu.dot_dimension_numbers<[1], [0], [0], [1], [0, 0, 1, 1], [], []>} : vector<16x128xf32>, vector<128x384xf32>, vector<16x384xf32> -> vector<16x384xf32>
    %9 = vector.extract_strided_slice %6 {offsets = [0, 0], sizes = [16, 128], strides = [1, 1]} : vector<16x384xf32> to vector<16x128xf32>
    %10 = vector.extract_strided_slice %6 {offsets = [0, 128], sizes = [16, 128], strides = [1, 1]} : vector<16x384xf32> to vector<16x128xf32>
    %11 = vector.extract_strided_slice %6 {offsets = [0, 256], sizes = [16, 128], strides = [1, 1]} : vector<16x384xf32> to vector<16x128xf32>
    %12 = vector.extract_strided_slice %8 {offsets = [0, 0], sizes = [16, 128], strides = [1, 1]} : vector<16x384xf32> to vector<16x128xf32>
    %13 = vector.extract_strided_slice %8 {offsets = [0, 128], sizes = [16, 128], strides = [1, 1]} : vector<16x384xf32> to vector<16x128xf32>
    %14 = vector.extract_strided_slice %8 {offsets = [0, 256], sizes = [16, 128], strides = [1, 1]} : vector<16x384xf32> to vector<16x128xf32>
    %c0_10 = arith.constant 0 : index
    %c0_11 = arith.constant 0 : index
    %15 = vector.load %arg6[%c0_10, %c0_11] : memref<1x128xf32, #tpu.memory_space<vmem>>, vector<1x128xf32>
    %16 = vector.broadcast %15 : vector<1x128xf32> to vector<16x128xf32>
    %17 = arith.addf %14, %16 : vector<16x128xf32>
    %18 = arith.addf %9, %12 : vector<16x128xf32>
    %19 = arith.negf %18 : vector<16x128xf32>
    %20 = math.exp %19 : vector<16x128xf32>
    %cst_12 = arith.constant 1.000000e+00 : f32
    %21 = vector.broadcast %cst_12 : f32 to vector<16x128xf32>
    %22 = arith.addf %21, %20 : vector<16x128xf32>
    %23 = arith.divf %21, %22 : vector<16x128xf32>
    %24 = arith.addf %10, %13 : vector<16x128xf32>
    %25 = arith.negf %24 : vector<16x128xf32>
    %26 = math.exp %25 : vector<16x128xf32>
    %cst_13 = arith.constant 1.000000e+00 : f32
    %27 = vector.broadcast %cst_13 : f32 to vector<16x128xf32>
    %28 = arith.addf %27, %26 : vector<16x128xf32>
    %29 = arith.divf %27, %28 : vector<16x128xf32>
    %30 = arith.mulf %23, %17 : vector<16x128xf32>
    %31 = arith.addf %11, %30 : vector<16x128xf32>
    %32 = math.tanh %31 : vector<16x128xf32>
    %33 = arith.subf %1, %32 : vector<16x128xf32>
    %34 = arith.mulf %29, %33 : vector<16x128xf32>
    %35 = arith.addf %32, %34 : vector<16x128xf32>
    %c0_14 = arith.constant 0 : index
    %c0_15 = arith.constant 0 : index
    %36 = vector.load %arg7[%c0_14, %c0_15] : memref<16x128xf32, #tpu.memory_space<vmem>>, vector<16x128xf32>
    tpu.vector_store %arg7[%c0_14, %c0_15], %35 {strides = array<i32>} : memref<16x128xf32, #tpu.memory_space<vmem>>, vector<16x128xf32>,
    return
  }
  func.func @transform_0(%arg0: i32) -> (i32, i32) {
    %c0_i32 = arith.constant 0 : i32
    %c0_i32_0 = arith.constant 0 : i32
    return %arg0, %c0_i32 : i32, i32
  }
  func.func @transform_1(%arg0: i32) -> (i32, i32) {
    %c0_i32 = arith.constant 0 : i32
    %c0_i32_0 = arith.constant 0 : i32
    return %arg0, %c0_i32 : i32, i32
  }
  func.func @transform_2(%arg0: i32) -> (i32, i32) {
    %c0_i32 = arith.constant 0 : i32
    %c0_i32_0 = arith.constant 0 : i32
    %c0_i32_1 = arith.constant 0 : i32
    return %c0_i32, %c0_i32_0 : i32, i32
  }
  func.func @transform_3(%arg0: i32) -> (i32, i32) {
    %c0_i32 = arith.constant 0 : i32
    %c0_i32_0 = arith.constant 0 : i32
    %c0_i32_1 = arith.constant 0 : i32
    return %c0_i32, %c0_i32_0 : i32, i32
  }
  func.func @transform_4(%arg0: i32) -> (i32, i32) {
    %c0_i32 = arith.constant 0 : i32
    %c0_i32_0 = arith.constant 0 : i32
    %c0_i32_1 = arith.constant 0 : i32
    return %c0_i32, %c0_i32_0 : i32, i32
  }
  func.func @transform_5(%arg0: i32) -> (i32, i32) {
    %c0_i32 = arith.constant 0 : i32
    %c0_i32_0 = arith.constant 0 : i32
    %c0_i32_1 = arith.constant 0 : i32
    return %c0_i32, %c0_i32_0 : i32, i32
  }
  func.func @transform_6(%arg0: i32) -> (i32, i32) {
    %c0_i32 = arith.constant 0 : i32
    %c0_i32_0 = arith.constant 0 : i32
    return %arg0, %c0_i32 : i32, i32
  }
}

</mosaic_0001>

<bundles_post_ra>
// kernel: attention_rnn_forward.1
= control target key start
LH: loop header
LB: loop body
LE: loop exit
PB: predicated region body
PF: predicated region fallthrough
CT: control target
= control target key end

     0   :  { %11 = vsyncpa [#allocation3], 0  ;;  %s1110_s0 = inlined_call_operand.hbm [shape: f32[16,128], index: 0, kind: input, shape index: {}]   ;;  %s1111_s1 = inlined_call_operand.hbm [shape: f32[16,128], index: 1, kind: input, shape index: {}]   ;;  %s1112_s2 = inlined_call_operand.hbm [shape: f32[128,384], index: 2, kind: input, shape index: {}]   ;;  %s1113_s3 = inlined_call_operand.hbm [shape: f32[128,384], index: 3, kind: input, shape index: {}]   ;;  %s1114_s4 = inlined_call_operand.vmem [shape: f32[1,384], index: 4, kind: input, shape index: {}]   ;;  %s1115_s5 = inlined_call_operand.vmem [shape: f32[1,128], index: 5, kind: input, shape index: {}]   ;;  %s1116_s6 = inlined_call_operand.hbm [shape: f32[16,128], index: 6, kind: output, shape index: {}]  }
   0x1   :  { %12 = vsyncpa [#allocation6], 0 }
   0x2   :  { %13 = vsyncpa [#allocation9], 0 }
   0x3   :  { %14 = vsyncpa [#allocation4], 0  ;;  %s965_s21 = smov [#allocation5]   ;;  %s966_s23 = smov [#allocation2]  }
   0x4   :  { %s32_s22 = sshll.u32 %s965_s21, 4  ;;  %s20_s24 = sshll.u32 %s966_s23, 4  ;;  %s33_s22 = int_to_ptr.vmem [resolvable:$true] %s32_s22  ;;  %s1010_s24 = int_to_ptr.vmem [resolvable:$true] %s20_s24 }
   0x5   :  { %s847_s27 = scalar_lea.hbm %s1111_s1, 256 }
   0x6   :  { %p848_p0 = scmp.ne.s32.totalorder %s1111_s1, %s847_s27  ;;  %p851_p1 = scmp.lt.u32.totalorder %s847_s27, %s1111_s1 }
   0x8   :  { %p853_p2 = pnand %p851_p1, %p848_p0 }
   0xa   :  { %856 = shalt.err (!%p853_p2)
}
   0xb   :  { %s857_s8 = scalar_lea.vmem %s33_s22, 256  ;;  %p862_p4 = scmp.lt.s32.totalorder %s33_s22, %s33_s22 }
   0xc   :  { %p858_p3 = scmp.ne.s32.totalorder %s33_s22, %s857_s8  ;;  %p863_p5 = scmp.lt.s32.totalorder %s857_s8, %s857_s8 }
   0xe   :  { %p864_p6 = por %p863_p5, %p862_p4 }
  0x10   :  { %p865_p7 = pnand %p864_p6, %p858_p3 }
  0x12   :  { %868 = shalt.err (!%p865_p7)
}
  0x13   :  { %s967_s9 = smov 128   ;;  %s968_s10 = smov 8  }
  0x14   :  { %38 = dma.hbm_to_vmem [thread:$0]  %s1111_s1, 256, %s33_s22, [#allocation6], %s967_s9, %s967_s9, %s968_s10  }
  0x15   :  { %s869_s15 = scalar_lea.hbm %s1110_s0, 256 }
  0x16   :  { %p870_p8 = scmp.ne.s32.totalorder %s1110_s0, %s869_s15  ;;  %p873_p9 = scmp.lt.u32.totalorder %s869_s15, %s1110_s0 }
  0x18   :  { %p875_p10 = pnand %p873_p9, %p870_p8 }
  0x1a   :  { %878 = shalt.err (!%p875_p10)
}
  0x1b   :  { %s879_s20 = scalar_lea.vmem %s1010_s24, 256  ;;  %p884_p12 = scmp.lt.s32.totalorder %s1010_s24, %s1010_s24 }
  0x1c   :  { %p880_p11 = scmp.ne.s32.totalorder %s1010_s24, %s879_s20  ;;  %p885_p13 = scmp.lt.s32.totalorder %s879_s20, %s879_s20 }
  0x1e   :  { %p886_p0 = por %p885_p13, %p884_p12 }
  0x20   :  { %p887_p1 = pnand %p886_p0, %p880_p11 }
  0x22   :  { %890 = shalt.err (!%p887_p1)
}
  0x23   :  { %26 = dma.hbm_to_vmem [thread:$0]  %s1110_s0, 256, %s1010_s24, [#allocation3], %s967_s9, %s967_s9, %s968_s10  }
  0x24   :  { %s969_s22 = smov [#allocation7]   ;;  %s891_s27 = scalar_lea.hbm %s1112_s2, 6144 }
  0x25   :  { %s44_s23 = sshll.u32 %s969_s22, 4  ;;  %p892_p2 = scmp.ne.s32.totalorder %s1112_s2, %s891_s27  ;;  %s45_s23 = int_to_ptr.vmem [resolvable:$true] %s44_s23 }
  0x26   :  { %p895_p3 = scmp.lt.u32.totalorder %s891_s27, %s1112_s2 }
  0x28   :  { %p897_p4 = pnand %p895_p3, %p892_p2 }
  0x2a   :  { %900 = shalt.err (!%p897_p4)
}
  0x2b   :  { %s901_s8 = scalar_lea.vmem %s45_s23, 6144  ;;  %p906_p6 = scmp.lt.s32.totalorder %s45_s23, %s45_s23 }
  0x2c   :  { %p902_p5 = scmp.ne.s32.totalorder %s45_s23, %s901_s8  ;;  %p907_p7 = scmp.lt.s32.totalorder %s901_s8, %s901_s8 }
  0x2e   :  { %p908_p8 = por %p907_p7, %p906_p6 }
  0x30   :  { %p909_p9 = pnand %p908_p8, %p902_p5 }
  0x32   :  { %912 = shalt.err (!%p909_p9)
}
  0x33   :  { %s970_s0 = smov 384   ;;  %s971_s24 = smov 24  }
  0x34   :  { %50 = dma.hbm_to_vmem [thread:$0]  %s1112_s2, 6144, %s45_s23, [#allocation6], %s970_s0, %s970_s0, %s971_s24  }
  0x35   :  { %s972_s13 = smov [#allocation8]   ;;  %s913_s17 = scalar_lea.hbm %s1113_s3, 6144 }
  0x36   :  { %s56_s14 = sshll.u32 %s972_s13, 4  ;;  %p914_p10 = scmp.ne.s32.totalorder %s1113_s3, %s913_s17  ;;  %s57_s14 = int_to_ptr.vmem [resolvable:$true] %s56_s14 }
  0x37   :  { %p917_p11 = scmp.lt.u32.totalorder %s913_s17, %s1113_s3 }
  0x39   :  { %p919_p12 = pnand %p917_p11, %p914_p10 }
  0x3b   :  { %922 = shalt.err (!%p919_p12)
}
  0x3c   :  { %s923_s21 = scalar_lea.vmem %s57_s14, 6144  ;;  %p928_p0 = scmp.lt.s32.totalorder %s57_s14, %s57_s14 }
  0x3d   :  { %p924_p13 = scmp.ne.s32.totalorder %s57_s14, %s923_s21  ;;  %p929_p1 = scmp.lt.s32.totalorder %s923_s21, %s923_s21 }
  0x3f   :  { %p930_p2 = por %p929_p1, %p928_p0 }
  0x41   :  { %p931_p3 = pnand %p930_p2, %p924_p13 }
  0x43   :  { %934 = shalt.err (!%p931_p3)
}
  0x44   :  { %62 = dma.hbm_to_vmem [thread:$0]  %s1113_s3, 6144, %s57_s14, [#allocation9], %s970_s0, %s970_s0, %s971_s24  }
  0x45   :  { %957 = dma.done.wait [#allocation3], 256  }
  0x46   :  { %958 = vsyncadd [#allocation3], 4294967040 }
  0x47   :  { %959 = dma.done.wait [#allocation6], 6400  }
  0x48   :  { %960 = vsyncadd [#allocation6], 4294960896 }
  0x49   :  { %961 = dma.done.wait [#allocation9], 6144  }
  0x4a   :  { %962 = vsyncadd [#allocation9], 4294961152  ;;  %v973_v0 = vmov 0.0   ;;  %v84_v1 = vld [vmem:[#allocation7 + $0x8] sm:$0xff]  ;;  %v87_v2 = vld [vmem:[#allocation7 + $0x20] sm:$0xff] }
  0x4b   :  { %212 = vmatprep.mubr.f32.mxu0 %v973_v0  ;;  %v83_v3 = vld [vmem:[#allocation7] sm:$0xff]  ;;  %v681_v4 = vpack.c.bf16 %v87_v2, %v84_v1  ;;  %v86_v5 = vld [vmem:[#allocation7 + $0x18] sm:$0xff]  ;;  %v93_v7 = vld [vmem:[#allocation7 + $0x50] sm:$0xff] }
  0x4c   :  { %v90_v6 = vld [vmem:[#allocation7 + $0x38] sm:$0xff]  ;;  %v683_v8 = vpack.c.bf16 %v86_v5, %v83_v3  ;;  %v89_v10 = vld [vmem:[#allocation7 + $0x30] sm:$0xff]  ;;  %v92_v11 = vld [vmem:[#allocation7 + $0x48] sm:$0xff] }
  0x4d   :  { %v685_v9 = vpack.c.bf16 %v93_v7, %v90_v6  ;;  %v96_v12 = vld [vmem:[#allocation7 + $0x68] sm:$0xff]  ;;  %682 = vmatprep.subr.bf16.mxu0 %v681_v4  ;;  %v99_v13 = vld [vmem:[#allocation7 + $0x80] sm:$0xff]  ;;  %v687_v14 = vpack.c.bf16 %v92_v11, %v89_v10  ;;  %v98_v17 = vld [vmem:[#allocation7 + $0x78] sm:$0xff] }
  0x4e   :  { %684 = vmatpush1.bf16.msra.mxu0 %v683_v8  ;;  %v689_v15 = vpack.c.bf16 %v99_v13, %v96_v12  ;;  %v95_v16 = vld [vmem:[#allocation7 + $0x60] sm:$0xff]  ;;  %v102_v18 = vld [vmem:[#allocation7 + $0x98] sm:$0xff]  ;;  %v105_v19 = vld [vmem:[#allocation7 + $0xb0] sm:$0xff] }
  0x4f   :  { %686 = vmatprep.subr.bf16.mxu0 %v685_v9  ;;  %v691_v20 = vpack.c.bf16 %v98_v17, %v95_v16  ;;  %v101_v21 = vld [vmem:[#allocation7 + $0x90] sm:$0xff]  ;;  %v693_v22 = vpack.c.bf16 %v105_v19, %v102_v18  ;;  %v104_v23 = vld [vmem:[#allocation7 + $0xa8] sm:$0xff]  ;;  %v111_v27 = vld [vmem:[#allocation7 + $0xe0] sm:$0xff] }
  0x50   :  { %v85_v24 = vld [vmem:[#allocation7 + $0x10] sm:$0xff]  ;;  %v88_v25 = vld [vmem:[#allocation7 + $0x28] sm:$0xff]  ;;  %v91_v29 = vld [vmem:[#allocation7 + $0x40] sm:$0xff]  ;;  %v695_v31 = vpack.c.bf16 %v104_v23, %v101_v21 }
  0x51   :  { %v108_v26 = vld [vmem:[#allocation7 + $0xc8] sm:$0xff]  ;;  %v713_v28 = vpack.c.bf16 %v88_v25, %v85_v24  ;;  %v94_v30 = vld [vmem:[#allocation7 + $0x58] sm:$0xff]  ;;  %v107_v32 = vld [vmem:[#allocation7 + $0xc0] sm:$0xff] }
  0x52   :  { %688 = vmatpush1.bf16.msra.mxu0 %v687_v14  ;;  %v110_v33 = vld [vmem:[#allocation7 + $0xd8] sm:$0xff]  ;;  %v717_v34 = vpack.c.bf16 %v94_v30, %v91_v29  ;;  %v697_v35 = vpack.c.bf16 %v111_v27, %v108_v26  ;;  %v1072_v36 = vld [vmem:[#allocation2] sm:$0xff]  ;;  %v97_v37 = vld [vmem:[#allocation7 + $0x70] sm:$0xff] }
  0x53   :  { %690 = vmatprep.subr.bf16.mxu0 %v689_v15  ;;  %714 = vmatprep.subr.bf16.mxu1 %v713_v28  ;;  %v100_v38 = vld [vmem:[#allocation7 + $0x88] sm:$0xff]  ;;  %v114_v39 = vld [vmem:[#allocation7 + $0xf8] sm:$0xff]  ;;  %v117_v40 = vld [vmem:[#allocation7 + $0x110] sm:$0xff]  ;;  %v699_v44 = vpack.c.bf16 %v110_v33, %v107_v32 }
  0x54   :  { %716 = vmatpush3.bf16.msra.mxu1 %v713_v28  ;;  %v721_v41 = vpack.c.bf16 %v100_v38, %v97_v37  ;;  %643 = vmatprep.mubr.f32.mxu1 %v1072_v36  ;;  %v103_v42 = vld [vmem:[#allocation7 + $0xa0] sm:$0xff]  ;;  %v106_v43 = vld [vmem:[#allocation7 + $0xb8] sm:$0xff]  ;;  %v701_v45 = vpack.c.bf16 %v117_v40, %v114_v39  ;;  %v113_v46 = vld [vmem:[#allocation7 + $0xf0] sm:$0xff] }
  0x55   :  { %718 = vmatprep.subr.bf16.mxu1 %v717_v34  ;;  %v116_v47 = vld [vmem:[#allocation7 + $0x108] sm:$0xff]  ;;  %v123_v49 = vld [vmem:[#allocation7 + $0x140] sm:$0xff]  ;;  %v725_v50 = vpack.c.bf16 %v106_v43, %v103_v42  ;;  %v109_v51 = vld [vmem:[#allocation7 + $0xd0] sm:$0xff] }
  0x56   :  { %692 = vmatpush1.bf16.msra.mxu0 %v691_v20  ;;  %v120_v48 = vld [vmem:[#allocation7 + $0x128] sm:$0xff]  ;;  %v703_v53 = vpack.c.bf16 %v116_v47, %v113_v46  ;;  %v119_v55 = vld [vmem:[#allocation7 + $0x120] sm:$0xff]  ;;  %v122_v56 = vld [vmem:[#allocation7 + $0x138] sm:$0xff] }
  0x57   :  { %694 = vmatprep.subr.bf16.mxu0 %v693_v22  ;;  %v112_v52 = vld [vmem:[#allocation7 + $0xe8] sm:$0xff]  ;;  %v705_v54 = vpack.c.bf16 %v123_v49, %v120_v48  ;;  %v126_v57 = vld [vmem:[#allocation7 + $0x158] sm:$0xff]  ;;  %v129_v58 = vld [vmem:[#allocation7 + $0x170] sm:$0xff]  ;;  %v707_v62 = vpack.c.bf16 %v122_v56, %v119_v55 }
  0x58   :  { %720 = vmatpush3.bf16.msra.mxu1 %v717_v34  ;;  %v729_v59 = vpack.c.bf16 %v112_v52, %v109_v51  ;;  %v115_v60 = vld [vmem:[#allocation7 + $0x100] sm:$0xff]  ;;  %v118_v61 = vld [vmem:[#allocation7 + $0x118] sm:$0xff]  ;;  %v709_v63 = vpack.c.bf16 %v129_v58, %v126_v57  ;;  %v125_v1 = vld [vmem:[#allocation7 + $0x150] sm:$0xff] }
  0x59   :  { %722 = vmatprep.subr.bf16.mxu1 %v721_v41  ;;  %v128_v2 = vld [vmem:[#allocation7 + $0x168] sm:$0xff]  ;;  %v304_v4 = vld [vmem:[#allocation8 + $0x20] sm:$0xff]  ;;  %v733_v5 = vpack.c.bf16 %v118_v61, %v115_v60  ;;  %v121_v6 = vld [vmem:[#allocation7 + $0x130] sm:$0xff] }
  0x5a   :  { %696 = vmatpush1.bf16.msra.mxu0 %v695_v31  ;;  %v301_v3 = vld [vmem:[#allocation8 + $0x8] sm:$0xff]  ;;  %v711_v8 = vpack.c.bf16 %v128_v2, %v125_v1  ;;  %v300_v10 = vld [vmem:[#allocation8] sm:$0xff]  ;;  %v303_v11 = vld [vmem:[#allocation8 + $0x18] sm:$0xff] }
  0x5b   :  { %698 = vmatprep.subr.bf16.mxu0 %v697_v35  ;;  %v124_v7 = vld [vmem:[#allocation7 + $0x148] sm:$0xff]  ;;  %v745_v9 = vpack.c.bf16 %v304_v4, %v301_v3  ;;  %v307_v12 = vld [vmem:[#allocation8 + $0x38] sm:$0xff]  ;;  %v310_v13 = vld [vmem:[#allocation8 + $0x50] sm:$0xff]  ;;  %v747_v17 = vpack.c.bf16 %v303_v11, %v300_v10 }
  0x5c   :  { %724 = vmatpush3.bf16.msra.mxu1 %v721_v41  ;;  %v737_v14 = vpack.c.bf16 %v124_v7, %v121_v6  ;;  %v127_v15 = vld [vmem:[#allocation7 + $0x160] sm:$0xff]  ;;  %v130_v16 = vld [vmem:[#allocation7 + $0x178] sm:$0xff]  ;;  %v749_v18 = vpack.c.bf16 %v310_v13, %v307_v12  ;;  %v306_v19 = vld [vmem:[#allocation8 + $0x30] sm:$0xff] }
  0x5d   :  { %726 = vmatprep.subr.bf16.mxu1 %v725_v50  ;;  %v309_v20 = vld [vmem:[#allocation8 + $0x48] sm:$0xff]  ;;  %v316_v22 = vld [vmem:[#allocation8 + $0x80] sm:$0xff]  ;;  %v741_v23 = vpack.c.bf16 %v130_v16, %v127_v15  ;;  %v302_v24 = vld [vmem:[#allocation8 + $0x10] sm:$0xff] }
  0x5e   :  { %700 = vmatpush1.bf16.msra.mxu0 %v699_v44  ;;  %v313_v21 = vld [vmem:[#allocation8 + $0x68] sm:$0xff]  ;;  %v751_v26 = vpack.c.bf16 %v309_v20, %v306_v19  ;;  %v312_v28 = vld [vmem:[#allocation8 + $0x60] sm:$0xff]  ;;  %v315_v29 = vld [vmem:[#allocation8 + $0x78] sm:$0xff] }
  0x5f   :  { %702 = vmatprep.subr.bf16.mxu0 %v701_v45  ;;  %v305_v25 = vld [vmem:[#allocation8 + $0x28] sm:$0xff]  ;;  %v753_v27 = vpack.c.bf16 %v316_v22, %v313_v21  ;;  %v319_v30 = vld [vmem:[#allocation8 + $0x98] sm:$0xff]  ;;  %v322_v31 = vld [vmem:[#allocation8 + $0xb0] sm:$0xff] }
  0x60   :  { %728 = vmatpush3.bf16.msra.mxu1 %v725_v50  ;;  %v777_v32 = vpack.c.bf16 %v305_v25, %v302_v24  ;;  %v80_v33 = vld [vmem:[#allocation2 + $0x8] sm:$0xff]  ;;  %v308_v34 = vld [vmem:[#allocation8 + $0x40] sm:$0xff]  ;;  %v311_v35 = vld [vmem:[#allocation8 + $0x58] sm:$0xff]  ;;  %v757_v37 = vpack.c.bf16 %v322_v31, %v319_v30  ;;  %v133_v25 = vlaneseq }
  0x61   :  { %730 = vmatprep.subr.bf16.mxu1 %v729_v59  ;;  %v318_v38 = vld [vmem:[#allocation8 + $0x90] sm:$0xff]  ;;  %v321_v39 = vld [vmem:[#allocation8 + $0xa8] sm:$0xff]  ;;  %v328_v41 = vld [vmem:[#allocation8 + $0xe0] sm:$0xff]  ;;  %v781_v42 = vpack.c.bf16 %v311_v35, %v308_v34 }
  0x62   :  { %704 = vmatpush1.bf16.msra.mxu0 %v703_v53  ;;  %v325_v40 = vld [vmem:[#allocation8 + $0xc8] sm:$0xff]  ;;  %v314_v43 = vld [vmem:[#allocation8 + $0x70] sm:$0xff]  ;;  %v759_v45 = vpack.c.bf16 %v321_v39, %v318_v38  ;;  %v324_v47 = vld [vmem:[#allocation8 + $0xc0] sm:$0xff] }
  0x63   :  { %706 = vmatprep.subr.bf16.mxu0 %v705_v54  ;;  %v317_v44 = vld [vmem:[#allocation8 + $0x88] sm:$0xff]  ;;  %v761_v46 = vpack.c.bf16 %v328_v41, %v325_v40  ;;  %v327_v48 = vld [vmem:[#allocation8 + $0xd8] sm:$0xff]  ;;  %v1078_v49 = vld [vmem:[#allocation5] sm:$0xff] }
  0x64   :  { %732 = vmatpush3.bf16.msra.mxu1 %v729_v59  ;;  %v331_v50 = vld [vmem:[#allocation8 + $0xf8] sm:$0xff]  ;;  %v334_v51 = vld [vmem:[#allocation8 + $0x110] sm:$0xff]  ;;  %v785_v52 = vpack.c.bf16 %v317_v44, %v314_v43  ;;  %v320_v53 = vld [vmem:[#allocation8 + $0xa0] sm:$0xff]  ;;  %v763_v55 = vpack.c.bf16 %v327_v48, %v324_v47 }
  0x65   :  { %734 = vmatprep.subr.bf16.mxu1 %v733_v5  ;;  %v323_v54 = vld [vmem:[#allocation8 + $0xb8] sm:$0xff]  ;;  %v765_v56 = vpack.c.bf16 %v334_v51, %v331_v50  ;;  %v330_v57 = vld [vmem:[#allocation8 + $0xf0] sm:$0xff]  ;;  %v333_v58 = vld [vmem:[#allocation8 + $0x108] sm:$0xff] }
  0x66   :  { %708 = vmatpush1.bf16.msra.mxu0 %v707_v62  ;;  %v337_v59 = vld [vmem:[#allocation8 + $0x128] sm:$0xff]  ;;  %v340_v60 = vld [vmem:[#allocation8 + $0x140] sm:$0xff]  ;;  %v789_v61 = vpack.c.bf16 %v323_v54, %v320_v53  ;;  %v326_v62 = vld [vmem:[#allocation8 + $0xd0] sm:$0xff]  ;;  %v767_v1 = vpack.c.bf16 %v333_v58, %v330_v57 }
  0x67   :  { %710 = vmatprep.subr.bf16.mxu0 %v709_v63  ;;  %v329_v63 = vld [vmem:[#allocation8 + $0xe8] sm:$0xff]  ;;  %v769_v2 = vpack.c.bf16 %v340_v60, %v337_v59  ;;  %v336_v3 = vld [vmem:[#allocation8 + $0x120] sm:$0xff]  ;;  %v339_v4 = vld [vmem:[#allocation8 + $0x138] sm:$0xff] }
  0x68   :  { %736 = vmatpush3.bf16.msra.mxu1 %v733_v5  ;;  %v343_v5 = vld [vmem:[#allocation8 + $0x158] sm:$0xff]  ;;  %v346_v6 = vld [vmem:[#allocation8 + $0x170] sm:$0xff]  ;;  %v793_v7 = vpack.c.bf16 %v329_v63, %v326_v62  ;;  %v771_v10 = vpack.c.bf16 %v339_v4, %v336_v3  ;;  %v345_v13 = vld [vmem:[#allocation8 + $0x168] sm:$0xff] }
  0x69   :  { %738 = vmatprep.subr.bf16.mxu1 %v737_v14  ;;  %v773_v11 = vpack.c.bf16 %v346_v6, %v343_v5  ;;  %v342_v12 = vld [vmem:[#allocation8 + $0x150] sm:$0xff]  ;;  %v341_v16 = vld [vmem:[#allocation8 + $0x148] sm:$0xff]  ;;  %v344_v19 = vld [vmem:[#allocation8 + $0x160] sm:$0xff] }
  0x6a   :  { %712 = vmatpush1.bf16.msra.mxu0 %v711_v8  ;;  %v332_v8 = vld [vmem:[#allocation8 + $0x100] sm:$0xff]  ;;  %v338_v15 = vld [vmem:[#allocation8 + $0x130] sm:$0xff]  ;;  %v347_v20 = vld [vmem:[#allocation8 + $0x178] sm:$0xff] }
  0x6b   :  { %746 = vmatprep.subr.bf16.mxu0 %v745_v9  ;;  %v335_v9 = vld [vmem:[#allocation8 + $0x118] sm:$0xff]  ;;  %v805_v21 = vpack.c.bf16 %v347_v20, %v344_v19  ;;  %v570_v51 = vld [vmem:[%s1115_s5] ss:$0 sm:$0xff]  ;;  %s974_s5 = smov [#allocation10]  }
  0x6c   :  { %740 = vmatpush3.bf16.msra.mxu1 %v737_v14  ;;  %v797_v14 = vpack.c.bf16 %v335_v9, %v332_v8  ;;  %v1083_v22 = vld [vmem:[#allocation5 + $0x8] sm:$0xff]  ;;  %s556_s26 = sshll.u32 %s974_s5, 4  ;;  %s557_s26 = int_to_ptr.vmem [resolvable:$true] %s556_s26 }
  0x6d   :  { %213 = vmatmul.mubr.f32.vlgmr.msra.gmra.mrb[0].mxu0 %v1072_v36  ;;  %742 = vmatprep.subr.bf16.mxu1 %v741_v23  ;;  %v755_v36 = vpack.c.bf16 %v315_v29, %v312_v28  ;;  %v131_v28 = vld [vmem:[%s1114_s4] sm:$0x7]  ;;  %s935_s27 = scalar_lea.vmem %s557_s26, 256  ;;  %p940_p5 = scmp.lt.s32.totalorder %s557_s26, %s557_s26 }
  0x6e   :  { %748 = vmatpush1.bf16.msra.mxu0 %v747_v17  ;;  %218 = vmatprep.mubr.f32.mxu0 %v973_v0  ;;  %v775_v17 = vpack.c.bf16 %v345_v13, %v342_v12  ;;  %p936_p4 = scmp.ne.s32.totalorder %s557_s26, %s935_s27  ;;  %p941_p6 = scmp.lt.s32.totalorder %s935_s27, %s935_s27 }
  0x6f   :  { %750 = vmatprep.subr.bf16.mxu0 %v749_v18  ;;  %v801_v18 = vpack.c.bf16 %v341_v16, %v338_v15 }
  0x70   :  { %744 = vmatpush3.bf16.msra.mxu1 %v741_v23  ;;  %p942_p7 = por %p941_p6, %p940_p5 }
  0x71   :  { %219 = vmatmul.mubr.f32.gmra.mrb[2].mxu0 %v80_v33  ;;  %778 = vmatprep.subr.bf16.mxu1 %v777_v32 }
  0x72   :  { %752 = vmatpush1.bf16.msra.mxu0 %v751_v26  ;;  %412 = vmatprep.mubr.f32.mxu0 %v973_v0  ;;  %v134_v26 = vshrl.u32 %v133_v25, 7  ;;  %p943_p8 = pnand %p942_p7, %p936_p4 }
  0x73   :  { %754 = vmatprep.subr.bf16.mxu0 %v753_v27  ;;  %644 = vmatmul.mubr.f32.vlgmr.msra.gmra.mrb[0].mxu1 %v80_v33 }
  0x74   :  { %780 = vmatpush3.bf16.msra.mxu1 %v777_v32  ;;  %678 = vmatprep.mubr.f32.mxu1 %v1078_v49  ;;  %v135_v27 = vsub.s32 0, %v134_v26  ;;  %v139_v31 = vsub.s32 1, %v134_v26  ;;  %v143_v50 = vsub.s32 2, %v134_v26 }
  0x75   :  { %782 = vmatprep.subr.bf16.mxu1 %v781_v42 }
  0x76   :  { %756 = vmatpush1.bf16.msra.mxu0 %v755_v36  ;;  %v136_v29 = vrot.slane %v131_v28, %v135_v27  ;;  %v140_v35 = vrot.slane %v131_v28, %v139_v31 }
  0x77   :  { %758 = vmatprep.subr.bf16.mxu0 %v757_v37 }
  0x78   :  { %784 = vmatpush3.bf16.msra.mxu1 %v781_v42 }
  0x79   :  { %786 = vmatprep.subr.bf16.mxu1 %v785_v52 }
  0x7a   :  { %760 = vmatpush1.bf16.msra.mxu0 %v759_v45 }
  0x7b   :  { %762 = vmatprep.subr.bf16.mxu0 %v761_v46 }
  0x7c   :  { %788 = vmatpush3.bf16.msra.mxu1 %v785_v52  ;;  %v144_v52 = vrot.slane %v131_v28, %v143_v50 }
  0x7d   :  { %790 = vmatprep.subr.bf16.mxu1 %v789_v61 }
  0x7e   :  { %764 = vmatpush1.bf16.msra.mxu0 %v763_v55 }
  0x7f   :  { %766 = vmatprep.subr.bf16.mxu0 %v765_v56 }
  0x80   :  { %792 = vmatpush3.bf16.msra.mxu1 %v789_v61 }
  0x81   :  { %794 = vmatprep.subr.bf16.mxu1 %v793_v7 }
  0x82   :  { %768 = vmatpush1.bf16.msra.mxu0 %v767_v1 }
  0x83   :  { %770 = vmatprep.subr.bf16.mxu0 %v769_v2 }
  0x84   :  { %796 = vmatpush3.bf16.msra.mxu1 %v793_v7 }
  0x85   :  { %798 = vmatprep.subr.bf16.mxu1 %v797_v14 }
  0x86   :  { %772 = vmatpush1.bf16.msra.mxu0 %v771_v10 }
  0x87   :  { %774 = vmatprep.subr.bf16.mxu0 %v773_v11 }
  0x88   :  { %800 = vmatpush3.bf16.msra.mxu1 %v797_v14 }
  0x89   :  { %802 = vmatprep.subr.bf16.mxu1 %v801_v18 }
  0x8a   :  { %776 = vmatpush1.bf16.msra.mxu0 %v775_v17 }
  0x8c   :  { %804 = vmatpush3.bf16.msra.mxu1 %v801_v18 }
  0x8d   :  { %413 = vmatmul.mubr.f32.vlgmr.msra.gmra.mrb[0].mxu0 %v1078_v49  ;;  %806 = vmatprep.subr.bf16.mxu1 %v805_v21 }
  0x8e   :  { %418 = vmatprep.mubr.f32.mxu0 %v973_v0 }
  0x90   :  { %808 = vmatpush3.bf16.msra.mxu1 %v805_v21 }
  0x91   :  { %419 = vmatmul.mubr.f32.gmra.mrb[2].mxu0 %v1083_v22 }
  0x93   :  { %679 = vmatmul.mubr.f32.vlgmr.msra.gmra.mrb[2].mxu1 %v1083_v22 }
 0x146   :  { %v645_v23 = vpop.f32.mrb[0].mxu1 }
 0x147   :  { %v291_v24 = vpop.f32.mrb[1].mxu1  ;;  %v297_v63 = vadd.f32 %v645_v23, %v144_v52 }
 0x148   :  { %v292_v56 = vadd.f32 %v291_v24, %v144_v52 }
 0x160   :  { %v414_v0 = vpop.f32.mrb[0].mxu0 }
 0x161   :  { %v809_v30 = vadd.f32 %v414_v0, %v136_v29  ;;  %v416_v32 = vpop.f32.mrb[1].mxu0 }
 0x162   :  { %v810_v39 = vadd.f32 %v416_v32, %v140_v35 }
 0x163   :  { %v571_v33 = vmul.f32 -1.442695, %v809_v30 }
 0x164   :  { %v420_v34 = vpop.f32.mrb[2].mxu0  ;;  %v573_v42 = vmul.f32 -1.442695, %v810_v39 }
 0x165   :  { %827 = vpow2.f32 %v571_v33  ;;  %v811_v36 = vadd.f32 %v420_v34, %v136_v29  ;;  %v422_v37 = vpop.f32.mrb[3].mxu0 }
 0x166   :  { %v680_v40 = vpop.f32.mrb[2].mxu1  ;;  %v812_v43 = vadd.f32 %v422_v37, %v140_v35 }
 0x167   :  { %v572_v38 = vmul.f32 -1.442695, %v811_v36  ;;  %v491_v41 = vpop.f32.mrb[3].mxu1  ;;  %v508_v57 = vadd.f32 %v680_v40, %v570_v51 }
 0x168   :  { %v574_v46 = vmul.f32 -1.442695, %v812_v43  ;;  %v507_v53 = vadd.f32 %v570_v51, %v491_v41 }
 0x169   :  { %829 = vpow2.f32 %v572_v38 }
 0x16a   :  { %831 = vpow2.f32 %v573_v42 }
 0x16f   :  { %v828_v44 = vpop.eup %827 }
 0x170   :  { %v517_v45 = vadd.f32 1.0, %v828_v44 }
 0x172   :  { %833 = vrcp.f32 %v517_v45 }
 0x173   :  { %v830_v47 = vpop.eup %829  ;;  %835 = vpow2.f32 %v574_v46 }
 0x174   :  { %v518_v48 = vadd.f32 1.0, %v830_v47  ;;  %v832_v54 = vpop.eup %831 }
 0x175   :  { %v531_v60 = vadd.f32 1.0, %v832_v54 }
 0x176   :  { %837 = vrcp.f32 %v518_v48 }
 0x17c   :  { %v834_v55 = vpop.eup %833 }
 0x17d   :  { %v537_v58 = vmul.f32 %v834_v55, %v507_v53  ;;  %v836_v59 = vpop.eup %835 }
 0x17e   :  { %v532_v2 = vadd.f32 1.0, %v836_v59 }
 0x17f   :  { %v539_v61 = vadd.f32 %v537_v58, %v292_v56 }
 0x180   :  { %v838_v62 = vpop.eup %837 }
 0x181   :  { %v538_v1 = vmul.f32 %v838_v62, %v508_v57  ;;  %839 = vtanh.f32 %v539_v61 }
 0x182   :  { %841 = vrcp.f32 %v531_v60 }
 0x183   :  { %v540_v3 = vadd.f32 %v538_v1, %v297_v63 }
 0x185   :  { %843 = vtanh.f32 %v540_v3 }
 0x186   :  { %845 = vrcp.f32 %v532_v2 }
 0x18b   :  { %v840_v4 = vpop.eup %839 }
 0x18c   :  { %v543_v5 = vsub.f32 %v1078_v49, %v840_v4  ;;  %v842_v6 = vpop.eup %841 }
 0x18e   :  { %v545_v7 = vmul.f32 %v842_v6, %v543_v5 }
 0x18f   :  { %v844_v8 = vpop.eup %843 }
 0x190   :  { %v544_v9 = vsub.f32 %v1083_v22, %v844_v8  ;;  %v547_v10 = vadd.f32 %v840_v4, %v545_v7  ;;  %v846_v11 = vpop.eup %845 }
 0x192   :  { %v546_v12 = vmul.f32 %v846_v11, %v544_v9  ;;  %549 = vst [vmem:[#allocation10] sm:$0xff] %v547_v10 }
 0x194   :  { %v548_v13 = vadd.f32 %v844_v8, %v546_v12 }
 0x196   :  { %550 = vst [vmem:[#allocation10 + $0x8] sm:$0xff] %v548_v13 }
 0x197   :  { %946 = shalt.err (!%p943_p8)
}
 0x198   :  { %s947_s30 = scalar_lea.hbm %s1116_s6, 256 }
 0x199   :  { %p948_p9 = scmp.ne.s32.totalorder %s1116_s6, %s947_s30  ;;  %p951_p10 = scmp.lt.u32.totalorder %s947_s30, %s1116_s6 }
 0x19b   :  { %p953_p11 = pnand %p951_p10, %p948_p9 }
 0x19d   :  { %956 = shalt.err (!%p953_p11)
}
 0x19e   :  { %562 = dma.vmem_to_hbm [thread:$0]  %s557_s26, 256, %s1116_s6, [#allocation4], %s967_s9, %s967_s9, %s968_s10  }
 0x19f   :  { %963 = dma.done.wait [#allocation4], 256  }
 0x1a0   :  { %964 = vsyncadd [#allocation4], 4294967040 }
 0x1a1   :  { %566 = vsyncpa [#allocation3], 1 }
 0x1a2   :  { %567 = vsyncpa [#allocation6], 1 }
 0x1a3   :  { %568 = vsyncpa [#allocation9], 1 }
 0x1a4   :  { %569 = vsyncpa [#allocation4], 1 }

</bundles_post_ra>
